<compile_context>
chip_gen: v7x
topology: tpu7x:2x2x1
jax: 0.10.0
libtpu: 0.0.40
codegen_flags: <defaults>
</compile_context>

<pallas_src>
import jax
import jax.numpy as jnp
from jax.experimental import pallas as pl
from jax.experimental.pallas import tpu as pltpu


def _fused_1x1_convs_kernel(x_ref, w1_ref, b1_ref, w2_ref, b2_ref, o_ref):
    # x_ref : (1, C_in, HW) VMEM tile (one image), HW on the lane axis
    # w1_ref: (C_in, C_in)  SMEM   b1_ref: (C_in,) SMEM
    # w2_ref: (C_out, C_in) SMEM   b2_ref: (C_out,) SMEM
    # o_ref : (1, C_out, HW) VMEM tile
    c_in = w1_ref.shape[0]
    c_out = w2_ref.shape[0]

    x = x_ref[0]  # (C_in, HW) f32

    # conv1 (1x1) + ReLU: unrolled scalar*vector FMAs on the VPU (skip the MXU,
    # K = C_in is tiny).  Weights are scalar SMEM reads, broadcast over lanes.
    h = []
    for oc in range(c_in):
        acc = x[0:1, :] * w1_ref[oc, 0]
        for ic in range(1, c_in):
            acc = acc + x[ic:ic + 1, :] * w1_ref[oc, ic]
        h.append(jnp.maximum(acc + b1_ref[oc], 0.0))

    # conv2 (1x1), same VPU scheme; assemble the full lane-dense (C_out, HW)
    # block in registers and store it once (unmasked vst).
    o_rows = []
    for oc in range(c_out):
        acc = h[0] * w2_ref[oc, 0]
        for ic in range(1, c_in):
            acc = acc + h[ic] * w2_ref[oc, ic]
        o_rows.append(acc + b2_ref[oc])

    o_ref[0] = jnp.concatenate(o_rows, axis=0).astype(o_ref.dtype)


def small_model_forward(x_nchw, w1, b1, w2, b2):
    """Forward pass of SmallModel, fully fused, native NCHW layout.

    x_nchw : (N, C_in, H, W) float32
    w1     : (C_in, C_in)   -- conv1.weight[:, :, 0, 0] (torch (out, in) layout)
    b1     : (C_in,)
    w2     : (C_out, C_in)  -- conv2.weight[:, :, 0, 0]
    b2     : (C_out,)
    returns: (N, C_out*H*W) float32, matching torch's reshape(N, -1).
    """
    N, C_in, H, W = x_nchw.shape
    C_out = w2.shape[0]
    HW = H * W

    # Free reshape (no transpose): channels stay the sublane axis, pixels the lanes.
    x3 = x_nchw.reshape(N, C_in, HW)

    out3 = pl.pallas_call(
        _fused_1x1_convs_kernel,
        out_shape=jax.ShapeDtypeStruct((N, C_out, HW), jnp.float32),
        grid_spec=pltpu.PrefetchScalarGridSpec(
            num_scalar_prefetch=0,
            grid=(N,),  # one image per grid step (one per TC on v7x)
            in_specs=[
                pl.BlockSpec((1, C_in, HW), lambda n: (n, 0, 0)),
                # Tiny weights/biases live in SMEM as scalars; resident for
                # the whole kernel, no per-iteration double-buffering.
                pl.BlockSpec(memory_space=pltpu.MemorySpace.SMEM),
                pl.BlockSpec(memory_space=pltpu.MemorySpace.SMEM),
                pl.BlockSpec(memory_space=pltpu.MemorySpace.SMEM),
                pl.BlockSpec(memory_space=pltpu.MemorySpace.SMEM),
            ],
            out_specs=pl.BlockSpec((1, C_out, HW), lambda n: (n, 0, 0)),
        ),
        compiler_params=pltpu.CompilerParams(
            dimension_semantics=("parallel",),
        ),
    )(x3, w1, b1, w2, b2)

    # Already NCHW order -> torch's reshape(N, -1) is a free reshape.
    return out3.reshape(N, C_out * HW)


def _reference_forward(x_nchw, w1, b1, w2, b2):
    """Pure-JAX reference (same math, torch (out, in) weight layout)."""
    N = x_nchw.shape[0]
    h = jnp.einsum("oi,nihw->nohw", w1, x_nchw) + b1[None, :, None, None]
    h = jnp.maximum(h, 0.0)
    o = jnp.einsum("oi,nihw->nohw", w2, h) + b2[None, :, None, None]
    return o.reshape(N, -1)


if __name__ == "__main__":
    # Shapes consistent with SmallModel(in_channel=4, out_channel=8).
    N, C_in, C_out, H, W = 2, 4, 8, 16, 16

    key = jax.random.PRNGKey(0)
    k_x, k_w1, k_b1, k_w2, k_b2 = jax.random.split(key, 5)

    x = jax.random.normal(k_x, (N, C_in, H, W), dtype=jnp.float32)

    # Conv2d weights kept in torch's (out, in) layout (kernel size 1x1 squeezed).
    w1 = jax.random.normal(k_w1, (C_in, C_in), dtype=jnp.float32) * 0.1
    b1 = jax.random.normal(k_b1, (C_in,), dtype=jnp.float32) * 0.1
    w2 = jax.random.normal(k_w2, (C_out, C_in), dtype=jnp.float32) * 0.1
    b2 = jax.random.normal(k_b2, (C_out,), dtype=jnp.float32) * 0.1

    out = small_model_forward(x, w1, b1, w2, b2)
    out = jax.block_until_ready(out)

    ref = _reference_forward(x, w1, b1, w2, b2)
    assert out.shape == (N, C_out * H * W), out.shape
    assert jnp.allclose(out, ref, atol=1e-5, rtol=1e-5), "mismatch vs reference"

    print("KERNEL_OK")
</pallas_src>

<mosaic_0001>
module attributes {stable_mosaic.version = 11 : i64} {
  func.func @_fused_1x1_convs_kernel(%arg0: i32, %arg1: memref<1x4x256xf32, #tpu.memory_space<vmem>>, %arg2: memref<4x4xf32, #tpu.memory_space<smem>>, %arg3: memref<4xf32, #tpu.memory_space<smem>>, %arg4: memref<8x4xf32, #tpu.memory_space<smem>>, %arg5: memref<8xf32, #tpu.memory_space<smem>>, %arg6: memref<1x8x256xf32, #tpu.memory_space<vmem>>) attributes {dimension_semantics = [#tpu.dimension_semantics<parallel>], iteration_bounds = array<i64: 2>, scalar_prefetch = 0 : i64, scratch_operands = 0 : i64, tpu.core_type = #tpu.core_type<tc>, window_params = [{transform_indices = @transform_0, window_bounds = array<i64: 1, 4, 256>}, {transform_indices = @transform_1, window_bounds = array<i64: 4, 4>}, {transform_indices = @transform_2, window_bounds = array<i64: 4>}, {transform_indices = @transform_3, window_bounds = array<i64: 8, 4>}, {transform_indices = @transform_4, window_bounds = array<i64: 8>}, {transform_indices = @transform_5, window_bounds = array<i64: 1, 8, 256>}]} {
    %c0 = arith.constant 0 : index
    %c0_0 = arith.constant 0 : index
    %c0_1 = arith.constant 0 : index
    %0 = vector.load %arg1[%c0, %c0_0, %c0_1] : memref<1x4x256xf32, #tpu.memory_space<vmem>>, vector<1x4x256xf32>
    %1 = vector.shape_cast %0 : vector<1x4x256xf32> to vector<4x256xf32>
    %2 = vector.extract_strided_slice %1 {offsets = [0, 0], sizes = [1, 256], strides = [1, 1]} : vector<4x256xf32> to vector<1x256xf32>
    %c0_2 = arith.constant 0 : index
    %c0_3 = arith.constant 0 : index
    %3 = memref.load %arg2[%c0_2, %c0_3] : memref<4x4xf32, #tpu.memory_space<smem>>
    %4 = vector.broadcast %3 : f32 to vector<1x256xf32>
    %5 = arith.mulf %2, %4 : vector<1x256xf32>
    %6 = vector.extract_strided_slice %1 {offsets = [1, 0], sizes = [1, 256], strides = [1, 1]} : vector<4x256xf32> to vector<1x256xf32>
    %c0_4 = arith.constant 0 : index
    %c1 = arith.constant 1 : index
    %7 = memref.load %arg2[%c0_4, %c1] : memref<4x4xf32, #tpu.memory_space<smem>>
    %8 = vector.broadcast %7 : f32 to vector<1x256xf32>
    %9 = arith.mulf %6, %8 : vector<1x256xf32>
    %10 = arith.addf %5, %9 : vector<1x256xf32>
    %11 = vector.extract_strided_slice %1 {offsets = [2, 0], sizes = [1, 256], strides = [1, 1]} : vector<4x256xf32> to vector<1x256xf32>
    %c0_5 = arith.constant 0 : index
    %c2 = arith.constant 2 : index
    %12 = memref.load %arg2[%c0_5, %c2] : memref<4x4xf32, #tpu.memory_space<smem>>
    %13 = vector.broadcast %12 : f32 to vector<1x256xf32>
    %14 = arith.mulf %11, %13 : vector<1x256xf32>
    %15 = arith.addf %10, %14 : vector<1x256xf32>
    %16 = vector.extract_strided_slice %1 {offsets = [3, 0], sizes = [1, 256], strides = [1, 1]} : vector<4x256xf32> to vector<1x256xf32>
    %c0_6 = arith.constant 0 : index
    %c3 = arith.constant 3 : index
    %17 = memref.load %arg2[%c0_6, %c3] : memref<4x4xf32, #tpu.memory_space<smem>>
    %18 = vector.broadcast %17 : f32 to vector<1x256xf32>
    %19 = arith.mulf %16, %18 : vector<1x256xf32>
    %20 = arith.addf %15, %19 : vector<1x256xf32>
    %c0_7 = arith.constant 0 : index
    %21 = memref.load %arg3[%c0_7] : memref<4xf32, #tpu.memory_space<smem>>
    %22 = vector.broadcast %21 : f32 to vector<1x256xf32>
    %23 = arith.addf %20, %22 : vector<1x256xf32>
    %cst = arith.constant 0.000000e+00 : f32
    %24 = vector.broadcast %cst : f32 to vector<1x256xf32>
    %25 = arith.maximumf %23, %24 : vector<1x256xf32>
    %26 = vector.extract_strided_slice %1 {offsets = [0, 0], sizes = [1, 256], strides = [1, 1]} : vector<4x256xf32> to vector<1x256xf32>
    %c1_8 = arith.constant 1 : index
    %c0_9 = arith.constant 0 : index
    %27 = memref.load %arg2[%c1_8, %c0_9] : memref<4x4xf32, #tpu.memory_space<smem>>
    %28 = vector.broadcast %27 : f32 to vector<1x256xf32>
    %29 = arith.mulf %26, %28 : vector<1x256xf32>
    %30 = vector.extract_strided_slice %1 {offsets = [1, 0], sizes = [1, 256], strides = [1, 1]} : vector<4x256xf32> to vector<1x256xf32>
    %c1_10 = arith.constant 1 : index
    %c1_11 = arith.constant 1 : index
    %31 = memref.load %arg2[%c1_10, %c1_11] : memref<4x4xf32, #tpu.memory_space<smem>>
    %32 = vector.broadcast %31 : f32 to vector<1x256xf32>
    %33 = arith.mulf %30, %32 : vector<1x256xf32>
    %34 = arith.addf %29, %33 : vector<1x256xf32>
    %35 = vector.extract_strided_slice %1 {offsets = [2, 0], sizes = [1, 256], strides = [1, 1]} : vector<4x256xf32> to vector<1x256xf32>
    %c1_12 = arith.constant 1 : index
    %c2_13 = arith.constant 2 : index
    %36 = memref.load %arg2[%c1_12, %c2_13] : memref<4x4xf32, #tpu.memory_space<smem>>
    %37 = vector.broadcast %36 : f32 to vector<1x256xf32>
    %38 = arith.mulf %35, %37 : vector<1x256xf32>
    %39 = arith.addf %34, %38 : vector<1x256xf32>
    %40 = vector.extract_strided_slice %1 {offsets = [3, 0], sizes = [1, 256], strides = [1, 1]} : vector<4x256xf32> to vector<1x256xf32>
    %c1_14 = arith.constant 1 : index
    %c3_15 = arith.constant 3 : index
    %41 = memref.load %arg2[%c1_14, %c3_15] : memref<4x4xf32, #tpu.memory_space<smem>>
    %42 = vector.broadcast %41 : f32 to vector<1x256xf32>
    %43 = arith.mulf %40, %42 : vector<1x256xf32>
    %44 = arith.addf %39, %43 : vector<1x256xf32>
    %c1_16 = arith.constant 1 : index
    %45 = memref.load %arg3[%c1_16] : memref<4xf32, #tpu.memory_space<smem>>
    %46 = vector.broadcast %45 : f32 to vector<1x256xf32>
    %47 = arith.addf %44, %46 : vector<1x256xf32>
    %cst_17 = arith.constant 0.000000e+00 : f32
    %48 = vector.broadcast %cst_17 : f32 to vector<1x256xf32>
    %49 = arith.maximumf %47, %48 : vector<1x256xf32>
    %50 = vector.extract_strided_slice %1 {offsets = [0, 0], sizes = [1, 256], strides = [1, 1]} : vector<4x256xf32> to vector<1x256xf32>
    %c2_18 = arith.constant 2 : index
    %c0_19 = arith.constant 0 : index
    %51 = memref.load %arg2[%c2_18, %c0_19] : memref<4x4xf32, #tpu.memory_space<smem>>
    %52 = vector.broadcast %51 : f32 to vector<1x256xf32>
    %53 = arith.mulf %50, %52 : vector<1x256xf32>
    %54 = vector.extract_strided_slice %1 {offsets = [1, 0], sizes = [1, 256], strides = [1, 1]} : vector<4x256xf32> to vector<1x256xf32>
    %c2_20 = arith.constant 2 : index
    %c1_21 = arith.constant 1 : index
    %55 = memref.load %arg2[%c2_20, %c1_21] : memref<4x4xf32, #tpu.memory_space<smem>>
    %56 = vector.broadcast %55 : f32 to vector<1x256xf32>
    %57 = arith.mulf %54, %56 : vector<1x256xf32>
    %58 = arith.addf %53, %57 : vector<1x256xf32>
    %59 = vector.extract_strided_slice %1 {offsets = [2, 0], sizes = [1, 256], strides = [1, 1]} : vector<4x256xf32> to vector<1x256xf32>
    %c2_22 = arith.constant 2 : index
    %c2_23 = arith.constant 2 : index
    %60 = memref.load %arg2[%c2_22, %c2_23] : memref<4x4xf32, #tpu.memory_space<smem>>
    %61 = vector.broadcast %60 : f32 to vector<1x256xf32>
    %62 = arith.mulf %59, %61 : vector<1x256xf32>
    %63 = arith.addf %58, %62 : vector<1x256xf32>
    %64 = vector.extract_strided_slice %1 {offsets = [3, 0], sizes = [1, 256], strides = [1, 1]} : vector<4x256xf32> to vector<1x256xf32>
    %c2_24 = arith.constant 2 : index
    %c3_25 = arith.constant 3 : index
    %65 = memref.load %arg2[%c2_24, %c3_25] : memref<4x4xf32, #tpu.memory_space<smem>>
    %66 = vector.broadcast %65 : f32 to vector<1x256xf32>
    %67 = arith.mulf %64, %66 : vector<1x256xf32>
    %68 = arith.addf %63, %67 : vector<1x256xf32>
    %c2_26 = arith.constant 2 : index
    %69 = memref.load %arg3[%c2_26] : memref<4xf32, #tpu.memory_space<smem>>
    %70 = vector.broadcast %69 : f32 to vector<1x256xf32>
    %71 = arith.addf %68, %70 : vector<1x256xf32>
    %cst_27 = arith.constant 0.000000e+00 : f32
    %72 = vector.broadcast %cst_27 : f32 to vector<1x256xf32>
    %73 = arith.maximumf %71, %72 : vector<1x256xf32>
    %74 = vector.extract_strided_slice %1 {offsets = [0, 0], sizes = [1, 256], strides = [1, 1]} : vector<4x256xf32> to vector<1x256xf32>
    %c3_28 = arith.constant 3 : index
    %c0_29 = arith.constant 0 : index
    %75 = memref.load %arg2[%c3_28, %c0_29] : memref<4x4xf32, #tpu.memory_space<smem>>
    %76 = vector.broadcast %75 : f32 to vector<1x256xf32>
    %77 = arith.mulf %74, %76 : vector<1x256xf32>
    %78 = vector.extract_strided_slice %1 {offsets = [1, 0], sizes = [1, 256], strides = [1, 1]} : vector<4x256xf32> to vector<1x256xf32>
    %c3_30 = arith.constant 3 : index
    %c1_31 = arith.constant 1 : index
    %79 = memref.load %arg2[%c3_30, %c1_31] : memref<4x4xf32, #tpu.memory_space<smem>>
    %80 = vector.broadcast %79 : f32 to vector<1x256xf32>
    %81 = arith.mulf %78, %80 : vector<1x256xf32>
    %82 = arith.addf %77, %81 : vector<1x256xf32>
    %83 = vector.extract_strided_slice %1 {offsets = [2, 0], sizes = [1, 256], strides = [1, 1]} : vector<4x256xf32> to vector<1x256xf32>
    %c3_32 = arith.constant 3 : index
    %c2_33 = arith.constant 2 : index
    %84 = memref.load %arg2[%c3_32, %c2_33] : memref<4x4xf32, #tpu.memory_space<smem>>
    %85 = vector.broadcast %84 : f32 to vector<1x256xf32>
    %86 = arith.mulf %83, %85 : vector<1x256xf32>
    %87 = arith.addf %82, %86 : vector<1x256xf32>
    %88 = vector.extract_strided_slice %1 {offsets = [3, 0], sizes = [1, 256], strides = [1, 1]} : vector<4x256xf32> to vector<1x256xf32>
    %c3_34 = arith.constant 3 : index
    %c3_35 = arith.constant 3 : index
    %89 = memref.load %arg2[%c3_34, %c3_35] : memref<4x4xf32, #tpu.memory_space<smem>>
    %90 = vector.broadcast %89 : f32 to vector<1x256xf32>
    %91 = arith.mulf %88, %90 : vector<1x256xf32>
    %92 = arith.addf %87, %91 : vector<1x256xf32>
    %c3_36 = arith.constant 3 : index
    %93 = memref.load %arg3[%c3_36] : memref<4xf32, #tpu.memory_space<smem>>
    %94 = vector.broadcast %93 : f32 to vector<1x256xf32>
    %95 = arith.addf %92, %94 : vector<1x256xf32>
    %cst_37 = arith.constant 0.000000e+00 : f32
    %96 = vector.broadcast %cst_37 : f32 to vector<1x256xf32>
    %97 = arith.maximumf %95, %96 : vector<1x256xf32>
    %c0_38 = arith.constant 0 : index
    %c0_39 = arith.constant 0 : index
    %98 = memref.load %arg4[%c0_38, %c0_39] : memref<8x4xf32, #tpu.memory_space<smem>>
    %99 = vector.broadcast %98 : f32 to vector<1x256xf32>
    %100 = arith.mulf %25, %99 : vector<1x256xf32>
    %c0_40 = arith.constant 0 : index
    %c1_41 = arith.constant 1 : index
    %101 = memref.load %arg4[%c0_40, %c1_41] : memref<8x4xf32, #tpu.memory_space<smem>>
    %102 = vector.broadcast %101 : f32 to vector<1x256xf32>
    %103 = arith.mulf %49, %102 : vector<1x256xf32>
    %104 = arith.addf %100, %103 : vector<1x256xf32>
    %c0_42 = arith.constant 0 : index
    %c2_43 = arith.constant 2 : index
    %105 = memref.load %arg4[%c0_42, %c2_43] : memref<8x4xf32, #tpu.memory_space<smem>>
    %106 = vector.broadcast %105 : f32 to vector<1x256xf32>
    %107 = arith.mulf %73, %106 : vector<1x256xf32>
    %108 = arith.addf %104, %107 : vector<1x256xf32>
    %c0_44 = arith.constant 0 : index
    %c3_45 = arith.constant 3 : index
    %109 = memref.load %arg4[%c0_44, %c3_45] : memref<8x4xf32, #tpu.memory_space<smem>>
    %110 = vector.broadcast %109 : f32 to vector<1x256xf32>
    %111 = arith.mulf %97, %110 : vector<1x256xf32>
    %112 = arith.addf %108, %111 : vector<1x256xf32>
    %c0_46 = arith.constant 0 : index
    %113 = memref.load %arg5[%c0_46] : memref<8xf32, #tpu.memory_space<smem>>
    %114 = vector.broadcast %113 : f32 to vector<1x256xf32>
    %115 = arith.addf %112, %114 : vector<1x256xf32>
    %c1_47 = arith.constant 1 : index
    %c0_48 = arith.constant 0 : index
    %116 = memref.load %arg4[%c1_47, %c0_48] : memref<8x4xf32, #tpu.memory_space<smem>>
    %117 = vector.broadcast %116 : f32 to vector<1x256xf32>
    %118 = arith.mulf %25, %117 : vector<1x256xf32>
    %c1_49 = arith.constant 1 : index
    %c1_50 = arith.constant 1 : index
    %119 = memref.load %arg4[%c1_49, %c1_50] : memref<8x4xf32, #tpu.memory_space<smem>>
    %120 = vector.broadcast %119 : f32 to vector<1x256xf32>
    %121 = arith.mulf %49, %120 : vector<1x256xf32>
    %122 = arith.addf %118, %121 : vector<1x256xf32>
    %c1_51 = arith.constant 1 : index
    %c2_52 = arith.constant 2 : index
    %123 = memref.load %arg4[%c1_51, %c2_52] : memref<8x4xf32, #tpu.memory_space<smem>>
    %124 = vector.broadcast %123 : f32 to vector<1x256xf32>
    %125 = arith.mulf %73, %124 : vector<1x256xf32>
    %126 = arith.addf %122, %125 : vector<1x256xf32>
    %c1_53 = arith.constant 1 : index
    %c3_54 = arith.constant 3 : index
    %127 = memref.load %arg4[%c1_53, %c3_54] : memref<8x4xf32, #tpu.memory_space<smem>>
    %128 = vector.broadcast %127 : f32 to vector<1x256xf32>
    %129 = arith.mulf %97, %128 : vector<1x256xf32>
    %130 = arith.addf %126, %129 : vector<1x256xf32>
    %c1_55 = arith.constant 1 : index
    %131 = memref.load %arg5[%c1_55] : memref<8xf32, #tpu.memory_space<smem>>
    %132 = vector.broadcast %131 : f32 to vector<1x256xf32>
    %133 = arith.addf %130, %132 : vector<1x256xf32>
    %c2_56 = arith.constant 2 : index
    %c0_57 = arith.constant 0 : index
    %134 = memref.load %arg4[%c2_56, %c0_57] : memref<8x4xf32, #tpu.memory_space<smem>>
    %135 = vector.broadcast %134 : f32 to vector<1x256xf32>
    %136 = arith.mulf %25, %135 : vector<1x256xf32>
    %c2_58 = arith.constant 2 : index
    %c1_59 = arith.constant 1 : index
    %137 = memref.load %arg4[%c2_58, %c1_59] : memref<8x4xf32, #tpu.memory_space<smem>>
    %138 = vector.broadcast %137 : f32 to vector<1x256xf32>
    %139 = arith.mulf %49, %138 : vector<1x256xf32>
    %140 = arith.addf %136, %139 : vector<1x256xf32>
    %c2_60 = arith.constant 2 : index
    %c2_61 = arith.constant 2 : index
    %141 = memref.load %arg4[%c2_60, %c2_61] : memref<8x4xf32, #tpu.memory_space<smem>>
    %142 = vector.broadcast %141 : f32 to vector<1x256xf32>
    %143 = arith.mulf %73, %142 : vector<1x256xf32>
    %144 = arith.addf %140, %143 : vector<1x256xf32>
    %c2_62 = arith.constant 2 : index
    %c3_63 = arith.constant 3 : index
    %145 = memref.load %arg4[%c2_62, %c3_63] : memref<8x4xf32, #tpu.memory_space<smem>>
    %146 = vector.broadcast %145 : f32 to vector<1x256xf32>
    %147 = arith.mulf %97, %146 : vector<1x256xf32>
    %148 = arith.addf %144, %147 : vector<1x256xf32>
    %c2_64 = arith.constant 2 : index
    %149 = memref.load %arg5[%c2_64] : memref<8xf32, #tpu.memory_space<smem>>
    %150 = vector.broadcast %149 : f32 to vector<1x256xf32>
    %151 = arith.addf %148, %150 : vector<1x256xf32>
    %c3_65 = arith.constant 3 : index
    %c0_66 = arith.constant 0 : index
    %152 = memref.load %arg4[%c3_65, %c0_66] : memref<8x4xf32, #tpu.memory_space<smem>>
    %153 = vector.broadcast %152 : f32 to vector<1x256xf32>
    %154 = arith.mulf %25, %153 : vector<1x256xf32>
    %c3_67 = arith.constant 3 : index
    %c1_68 = arith.constant 1 : index
    %155 = memref.load %arg4[%c3_67, %c1_68] : memref<8x4xf32, #tpu.memory_space<smem>>
    %156 = vector.broadcast %155 : f32 to vector<1x256xf32>
    %157 = arith.mulf %49, %156 : vector<1x256xf32>
    %158 = arith.addf %154, %157 : vector<1x256xf32>
    %c3_69 = arith.constant 3 : index
    %c2_70 = arith.constant 2 : index
    %159 = memref.load %arg4[%c3_69, %c2_70] : memref<8x4xf32, #tpu.memory_space<smem>>
    %160 = vector.broadcast %159 : f32 to vector<1x256xf32>
    %161 = arith.mulf %73, %160 : vector<1x256xf32>
    %162 = arith.addf %158, %161 : vector<1x256xf32>
    %c3_71 = arith.constant 3 : index
    %c3_72 = arith.constant 3 : index
    %163 = memref.load %arg4[%c3_71, %c3_72] : memref<8x4xf32, #tpu.memory_space<smem>>
    %164 = vector.broadcast %163 : f32 to vector<1x256xf32>
    %165 = arith.mulf %97, %164 : vector<1x256xf32>
    %166 = arith.addf %162, %165 : vector<1x256xf32>
    %c3_73 = arith.constant 3 : index
    %167 = memref.load %arg5[%c3_73] : memref<8xf32, #tpu.memory_space<smem>>
    %168 = vector.broadcast %167 : f32 to vector<1x256xf32>
    %169 = arith.addf %166, %168 : vector<1x256xf32>
    %c4 = arith.constant 4 : index
    %c0_74 = arith.constant 0 : index
    %170 = memref.load %arg4[%c4, %c0_74] : memref<8x4xf32, #tpu.memory_space<smem>>
    %171 = vector.broadcast %170 : f32 to vector<1x256xf32>
    %172 = arith.mulf %25, %171 : vector<1x256xf32>
    %c4_75 = arith.constant 4 : index
    %c1_76 = arith.constant 1 : index
    %173 = memref.load %arg4[%c4_75, %c1_76] : memref<8x4xf32, #tpu.memory_space<smem>>
    %174 = vector.broadcast %173 : f32 to vector<1x256xf32>
    %175 = arith.mulf %49, %174 : vector<1x256xf32>
    %176 = arith.addf %172, %175 : vector<1x256xf32>
    %c4_77 = arith.constant 4 : index
    %c2_78 = arith.constant 2 : index
    %177 = memref.load %arg4[%c4_77, %c2_78] : memref<8x4xf32, #tpu.memory_space<smem>>
    %178 = vector.broadcast %177 : f32 to vector<1x256xf32>
    %179 = arith.mulf %73, %178 : vector<1x256xf32>
    %180 = arith.addf %176, %179 : vector<1x256xf32>
    %c4_79 = arith.constant 4 : index
    %c3_80 = arith.constant 3 : index
    %181 = memref.load %arg4[%c4_79, %c3_80] : memref<8x4xf32, #tpu.memory_space<smem>>
    %182 = vector.broadcast %181 : f32 to vector<1x256xf32>
    %183 = arith.mulf %97, %182 : vector<1x256xf32>
    %184 = arith.addf %180, %183 : vector<1x256xf32>
    %c4_81 = arith.constant 4 : index
    %185 = memref.load %arg5[%c4_81] : memref<8xf32, #tpu.memory_space<smem>>
    %186 = vector.broadcast %185 : f32 to vector<1x256xf32>
    %187 = arith.addf %184, %186 : vector<1x256xf32>
    %c5 = arith.constant 5 : index
    %c0_82 = arith.constant 0 : index
    %188 = memref.load %arg4[%c5, %c0_82] : memref<8x4xf32, #tpu.memory_space<smem>>
    %189 = vector.broadcast %188 : f32 to vector<1x256xf32>
    %190 = arith.mulf %25, %189 : vector<1x256xf32>
    %c5_83 = arith.constant 5 : index
    %c1_84 = arith.constant 1 : index
    %191 = memref.load %arg4[%c5_83, %c1_84] : memref<8x4xf32, #tpu.memory_space<smem>>
    %192 = vector.broadcast %191 : f32 to vector<1x256xf32>
    %193 = arith.mulf %49, %192 : vector<1x256xf32>
    %194 = arith.addf %190, %193 : vector<1x256xf32>
    %c5_85 = arith.constant 5 : index
    %c2_86 = arith.constant 2 : index
    %195 = memref.load %arg4[%c5_85, %c2_86] : memref<8x4xf32, #tpu.memory_space<smem>>
    %196 = vector.broadcast %195 : f32 to vector<1x256xf32>
    %197 = arith.mulf %73, %196 : vector<1x256xf32>
    %198 = arith.addf %194, %197 : vector<1x256xf32>
    %c5_87 = arith.constant 5 : index
    %c3_88 = arith.constant 3 : index
    %199 = memref.load %arg4[%c5_87, %c3_88] : memref<8x4xf32, #tpu.memory_space<smem>>
    %200 = vector.broadcast %199 : f32 to vector<1x256xf32>
    %201 = arith.mulf %97, %200 : vector<1x256xf32>
    %202 = arith.addf %198, %201 : vector<1x256xf32>
    %c5_89 = arith.constant 5 : index
    %203 = memref.load %arg5[%c5_89] : memref<8xf32, #tpu.memory_space<smem>>
    %204 = vector.broadcast %203 : f32 to vector<1x256xf32>
    %205 = arith.addf %202, %204 : vector<1x256xf32>
    %c6 = arith.constant 6 : index
    %c0_90 = arith.constant 0 : index
    %206 = memref.load %arg4[%c6, %c0_90] : memref<8x4xf32, #tpu.memory_space<smem>>
    %207 = vector.broadcast %206 : f32 to vector<1x256xf32>
    %208 = arith.mulf %25, %207 : vector<1x256xf32>
    %c6_91 = arith.constant 6 : index
    %c1_92 = arith.constant 1 : index
    %209 = memref.load %arg4[%c6_91, %c1_92] : memref<8x4xf32, #tpu.memory_space<smem>>
    %210 = vector.broadcast %209 : f32 to vector<1x256xf32>
    %211 = arith.mulf %49, %210 : vector<1x256xf32>
    %212 = arith.addf %208, %211 : vector<1x256xf32>
    %c6_93 = arith.constant 6 : index
    %c2_94 = arith.constant 2 : index
    %213 = memref.load %arg4[%c6_93, %c2_94] : memref<8x4xf32, #tpu.memory_space<smem>>
    %214 = vector.broadcast %213 : f32 to vector<1x256xf32>
    %215 = arith.mulf %73, %214 : vector<1x256xf32>
    %216 = arith.addf %212, %215 : vector<1x256xf32>
    %c6_95 = arith.constant 6 : index
    %c3_96 = arith.constant 3 : index
    %217 = memref.load %arg4[%c6_95, %c3_96] : memref<8x4xf32, #tpu.memory_space<smem>>
    %218 = vector.broadcast %217 : f32 to vector<1x256xf32>
    %219 = arith.mulf %97, %218 : vector<1x256xf32>
    %220 = arith.addf %216, %219 : vector<1x256xf32>
    %c6_97 = arith.constant 6 : index
    %221 = memref.load %arg5[%c6_97] : memref<8xf32, #tpu.memory_space<smem>>
    %222 = vector.broadcast %221 : f32 to vector<1x256xf32>
    %223 = arith.addf %220, %222 : vector<1x256xf32>
    %c7 = arith.constant 7 : index
    %c0_98 = arith.constant 0 : index
    %224 = memref.load %arg4[%c7, %c0_98] : memref<8x4xf32, #tpu.memory_space<smem>>
    %225 = vector.broadcast %224 : f32 to vector<1x256xf32>
    %226 = arith.mulf %25, %225 : vector<1x256xf32>
    %c7_99 = arith.constant 7 : index
    %c1_100 = arith.constant 1 : index
    %227 = memref.load %arg4[%c7_99, %c1_100] : memref<8x4xf32, #tpu.memory_space<smem>>
    %228 = vector.broadcast %227 : f32 to vector<1x256xf32>
    %229 = arith.mulf %49, %228 : vector<1x256xf32>
    %230 = arith.addf %226, %229 : vector<1x256xf32>
    %c7_101 = arith.constant 7 : index
    %c2_102 = arith.constant 2 : index
    %231 = memref.load %arg4[%c7_101, %c2_102] : memref<8x4xf32, #tpu.memory_space<smem>>
    %232 = vector.broadcast %231 : f32 to vector<1x256xf32>
    %233 = arith.mulf %73, %232 : vector<1x256xf32>
    %234 = arith.addf %230, %233 : vector<1x256xf32>
    %c7_103 = arith.constant 7 : index
    %c3_104 = arith.constant 3 : index
    %235 = memref.load %arg4[%c7_103, %c3_104] : memref<8x4xf32, #tpu.memory_space<smem>>
    %236 = vector.broadcast %235 : f32 to vector<1x256xf32>
    %237 = arith.mulf %97, %236 : vector<1x256xf32>
    %238 = arith.addf %234, %237 : vector<1x256xf32>
    %c7_105 = arith.constant 7 : index
    %239 = memref.load %arg5[%c7_105] : memref<8xf32, #tpu.memory_space<smem>>
    %240 = vector.broadcast %239 : f32 to vector<1x256xf32>
    %241 = arith.addf %238, %240 : vector<1x256xf32>
    %242 = tpu.concatenate %115, %133, %151, %169, %187, %205, %223, %241 in 0 : vector<1x256xf32>, vector<1x256xf32>, vector<1x256xf32>, vector<1x256xf32>, vector<1x256xf32>, vector<1x256xf32>, vector<1x256xf32>, vector<1x256xf32> -> vector<8x256xf32>
    %c0_106 = arith.constant 0 : index
    %c0_107 = arith.constant 0 : index
    %c0_108 = arith.constant 0 : index
    %243 = vector.load %arg6[%c0_106, %c0_107, %c0_108] : memref<1x8x256xf32, #tpu.memory_space<vmem>>, vector<1x8x256xf32>
    %244 = vector.shape_cast %243 : vector<1x8x256xf32> to vector<8x256xf32>
    %245 = vector.shape_cast %242 : vector<8x256xf32> to vector<1x8x256xf32>
    tpu.vector_store %arg6[%c0_106, %c0_107, %c0_108], %245 {strides = array<i32>} : memref<1x8x256xf32, #tpu.memory_space<vmem>>, vector<1x8x256xf32>,
    return
  }
  func.func @transform_0(%arg0: i32) -> (i32, i32, i32) {
    %c0_i32 = arith.constant 0 : i32
    %c0_i32_0 = arith.constant 0 : i32
    %c0_i32_1 = arith.constant 0 : i32
    return %arg0, %c0_i32, %c0_i32_0 : i32, i32, i32
  }
  func.func @transform_1(%arg0: i32) -> (i32, i32) {
    %c0_i32 = arith.constant 0 : i32
    %c0_i32_0 = arith.constant 0 : i32
    %c0_i32_1 = arith.constant 0 : i32
    return %c0_i32, %c0_i32_0 : i32, i32
  }
  func.func @transform_2(%arg0: i32) -> i32 {
    %c0_i32 = arith.constant 0 : i32
    %c0_i32_0 = arith.constant 0 : i32
    return %c0_i32 : i32
  }
  func.func @transform_3(%arg0: i32) -> (i32, i32) {
    %c0_i32 = arith.constant 0 : i32
    %c0_i32_0 = arith.constant 0 : i32
    %c0_i32_1 = arith.constant 0 : i32
    return %c0_i32, %c0_i32_0 : i32, i32
  }
  func.func @transform_4(%arg0: i32) -> i32 {
    %c0_i32 = arith.constant 0 : i32
    %c0_i32_0 = arith.constant 0 : i32
    return %c0_i32 : i32
  }
  func.func @transform_5(%arg0: i32) -> (i32, i32, i32) {
    %c0_i32 = arith.constant 0 : i32
    %c0_i32_0 = arith.constant 0 : i32
    %c0_i32_1 = arith.constant 0 : i32
    return %arg0, %c0_i32, %c0_i32_0 : i32, i32, i32
  }
}

</mosaic_0001>

<bundles_post_ra>
// kernel: tpu_custom_call.1
= control target key start
LH: loop header
LB: loop body
LE: loop exit
PB: predicated region body
PF: predicated region fallthrough
CT: control target
= control target key end

     0   :  { %s1679_s0 = inlined_call_operand.hbm [shape: f32[2,4,256], index: 0, kind: input, shape index: {}]   ;;  %s1680_s1 = inlined_call_operand.vmem [shape: f32[4,4], index: 1, kind: input, shape index: {}]   ;;  %s1681_s2 = inlined_call_operand.vmem [shape: f32[4], index: 2, kind: input, shape index: {}]   ;;  %s1682_s3 = inlined_call_operand.vmem [shape: f32[8,4], index: 3, kind: input, shape index: {}]   ;;  %s1683_s4 = inlined_call_operand.vmem [shape: f32[8], index: 4, kind: input, shape index: {}]   ;;  %s1684_s5 = inlined_call_operand.hbm [shape: f32[2,8,256], index: 5, kind: output, shape index: {}]  }
   0x1   :  { %1688 = sst [smem:[#allocation18_spill]] %s1679_s0 }
   0x2   :  { %10 = vsyncpa [#allocation3], 0 }
   0x3   :  { %12 = vsyncpa [#allocation3 + $0x1], 0 }
   0x4   :  { %13 = vsyncpa [#allocation5], 0 }
   0x5   :  { %14 = vsyncpa [#allocation8], 0 }
   0x6   :  { %15 = vsyncpa [#allocation11], 0 }
   0x7   :  { %16 = vsyncpa [#allocation4], 0 }
   0x8   :  { %18 = vsyncpa [#allocation4 + $0x1], 0  ;;  %s1184_s18 = smov 0   ;;  %s1186_s19 = smov 0  }
   0x9   :  { %s1188_s20 = smov 0   ;;  %s1190_s21 = smov 0  }
   0xa LB: > { %s189_s24 = sshll.u32 %s1681_s2, 4  ;;  %s1208_s25 = sadd.s32 4294967295, %s1146_s21   ;;  %s1146_s21 = sphi %s1190_s21, %s1711_s21   ;;  %s1142_s20 = sphi %s1188_s20, %s1710_s20   ;;  %s1138_s19 = sphi %s1186_s19, %s1709_s19   ;;  %s1134_s18 = sphi %s1184_s18, %s1708_s18   ;;  %s190_s24 = int_to_ptr.vmem [resolvable:$true] %s189_s24 }
   0xb   : > { %p800_p0 = scmp.ge.s32.totalorder %s1146_s21, 1  ;;  %p1685_p1 = scmp.eq.s32.totalorder %s1208_s25, 0 }
   0xc   : > { %p165_p2 = scmp.lt.s32.totalorder %s1146_s21, 3  ;;  %s178_s29 = sshll.u32 %s1680_s1, 4  ;;  %s179_s29 = int_to_ptr.vmem [resolvable:$true] %s178_s29 }
   0xd   : > { %s200_s7 = sshll.u32 %s1682_s3, 4  ;;  %s211_s11 = sshll.u32 %s1683_s4, 4  ;;  %s1232_s7 = int_to_ptr.vmem [resolvable:$true] %s200_s7  ;;  %s1237_s11 = int_to_ptr.vmem [resolvable:$true] %s211_s11 }
   0xe   : > { %p1213_p3 = pnand %p800_p0, %p165_p2  ;;  %s978_s12 = scalar_lea.vmem %s190_s24, 16 }
   0xf   : > { %p979_p7 = scmp.ne.s32.totalorder %s190_s24, %s978_s12  ;;  %p986_p11 = scmp.lt.s32.totalorder %s190_s24, %s190_s24 }
  0x10   : > { %s1689_s26 = scalar_select %p1213_p3, 1, 0 }
  0x11   : > { %p911_p5 = pneg %p1213_p3  ;;  %p987_p12 = scmp.lt.s32.totalorder %s978_s12, %s978_s12 }
  0x13   : > { %p1228_p6 = pnand %p911_p5, %p1685_p1  ;;  %p988_p13 = por %p987_p12, %p986_p11 }
  0x15   : > { %p980_p8 = pneg %p1228_p6 }
  0x17   : > { %p981_p9 = pnand %p980_p8, %p979_p7 }
  0x19   : > { %p982_p10 = pneg %p981_p9 }
  0x1b   : > { %p989_p0 = pnand %p988_p13, %p982_p10 }
  0x1d   : > { %992 = shalt.err (!%p989_p0)
}
  0x1e   : > { %s1148_s13 = smov [#allocation7]   ;;  %s993_s14 = scalar_lea.vmem %s179_s29, 64 }
  0x1f   : > { %917 = dma.vmem_to_smem (!%p1228_p6), %s190_s24, 16, %s1148_s13, [#allocation8]  }
  0x20   : > { %p994_p2 = scmp.ne.s32.totalorder %s179_s29, %s993_s14  ;;  %p1001_p1 = scmp.lt.s32.totalorder %s179_s29, %s179_s29 }
  0x21   : > { %p1002_p3 = scmp.lt.s32.totalorder %s993_s14, %s993_s14 }
  0x22   : > { %p996_p5 = pnand %p994_p2, %p980_p8 }
  0x23   : > { %p1003_p7 = por %p1002_p3, %p1001_p1 }
  0x24   : > { %p997_p4 = pneg %p996_p5 }
  0x26   : > { %p1004_p9 = pnand %p1003_p7, %p997_p4 }
  0x28   : > { %1007 = shalt.err (!%p1004_p9)
}
  0x29   : > { %s1149_s15 = smov [#allocation6]   ;;  %s1008_s16 = scalar_lea.vmem %s1232_s7, 128 }
  0x2a   : > { %914 = dma.vmem_to_smem (!%p1228_p6), %s179_s29, 64, %s1149_s15, [#allocation5]  }
  0x2b   : > { %p1009_p10 = scmp.ne.s32.totalorder %s1232_s7, %s1008_s16  ;;  %p1016_p13 = scmp.lt.s32.totalorder %s1232_s7, %s1232_s7 }
  0x2c   : > { %p1017_p0 = scmp.lt.s32.totalorder %s1008_s16, %s1008_s16 }
  0x2d   : > { %p1011_p11 = pnand %p1009_p10, %p980_p8 }
  0x2e   : > { %p1018_p1 = por %p1017_p0, %p1016_p13 }
  0x2f   : > { %p1012_p12 = pneg %p1011_p11 }
  0x31   : > { %p1019_p3 = pnand %p1018_p1, %p1012_p12 }
  0x33   : > { %1022 = shalt.err (!%p1019_p3)
}
  0x34   : > { %s1150_s17 = smov [#allocation9]   ;;  %s1023_s22 = scalar_lea.vmem %s1237_s11, 16 }
  0x35   : > { %920 = dma.vmem_to_smem (!%p1228_p6), %s1232_s7, 128, %s1150_s17, [#allocation8]  }
  0x36   : > { %p1024_p4 = scmp.ne.s32.totalorder %s1237_s11, %s1023_s22  ;;  %p1031_p7 = scmp.lt.s32.totalorder %s1237_s11, %s1237_s11 }
  0x37   : > { %p1032_p9 = scmp.lt.s32.totalorder %s1023_s22, %s1023_s22 }
  0x38   : > { %p1026_p2 = pnand %p1024_p4, %p980_p8 }
  0x39   : > { %p1033_p10 = por %p1032_p9, %p1031_p7 }
  0x3a   : > { %p1027_p5 = pneg %p1026_p2 }
  0x3c   : > { %p1034_p11 = pnand %p1033_p10, %p1027_p5 }
  0x3e   : > { %1037 = shalt.err (!%p1034_p11)
}
  0x3f   : > { %s1151_s23 = smov [#allocation10]   ;;  %s799_s24 = sadd.s32 4294967294, %s1146_s21  }
  0x40   : > { %923 = dma.vmem_to_smem (!%p1228_p6), %s1237_s11, 16, %s1151_s23, [#allocation11]  }
  0x41   : > { %s1273_s27 = sadd.s32 1, %s1146_s21   ;;  %s31_s29 = sadd.s32 1, %s1142_s20 }
  0x42   : > { %s28_s28 = ssub.s32 %s1146_s21, %s1273_s27  ;;  %p38_p12 = scmp.ne.s32.totalorder %s1142_s20, %s1138_s19 }
  0x43   : > { %p29_p8 = scmp.eq.s32.totalorder %s28_s28, 0  ;;  %p39_p13 = scmp.eq.s32.totalorder %s1146_s21, 0 }
  0x44   : > { %p44_p0 = scmp.ne.s32.totalorder %s1138_s19, %s1134_s18  ;;  %p1692_p3 = scmp.eq.s32.totalorder %s1208_s25, 0 }
  0x45   : > { %s1284_s30 = scalar_select %p29_p8, %s1142_s20, %s31_s29  }
  0x46   : > { %p1286_p1 = por %p39_p13, %p38_p12  ;;  %p1292_p6 = por %p1692_p3, %p44_p0 }
  0x47   : > { %p152_p4 = scmp.eq.s32.totalorder %s1208_s25, 1  ;;  %p158_p2 = scmp.eq.s32.totalorder %s799_s24, 1 }
  0x48   : > { %p936_p5 = scmp.lt.s32.totalorder %s1146_s21, 2  ;;  %s222_s8 = sand.u32 1, %s1142_s20  }
  0x49   : > { %p1299_p7 = por %p152_p4, %p38_p12  ;;  %p1303_p9 = por %p158_p2, %p44_p0 }
  0x4a   : > { %s806_s11 = sshll.u32 %s222_s8, 3  ;;  %s889_s12 = sshll.u32 %s1146_s21, 7 }
  0x4b   : > { %s1694_s9 = scalar_select %p1299_p7, 1, 0 }
  0x4c   : > { %s1695_s10 = scalar_select %p1303_p9, 1, 0 }
  0x4d   : > { %s1696_s0 = sld [smem:[#allocation18_spill]]  ;;  %s226_s16 = scalar_lea.vmem [#allocation2], %s806_s11 }
  0x4e   : > { %s234_s17 = sshll.u32 %s226_s16, 4  ;;  %p1317_p10 = pnand %p936_p5, %p1286_p1  ;;  %s1313_s17 = int_to_ptr.vmem [resolvable:$true] %s234_s17 }
  0x4f   : > { %s223_s23 = scalar_lea.sflag [#allocation3], %s222_s8 }
  0x50   : > { %p1040_p8 = pneg %p1317_p10 }
  0x53   : > { %s1311_s15 = scalar_lea.hbm %s1696_s0, %s889_s12  ;;  %s1043_s11 = scalar_lea.hbm %s1696_s0, 256 }
  0x54   : > { %s1038_s24 = scalar_lea.hbm %s1311_s15, 128  ;;  %p1044_p0 = scmp.lt.u32.totalorder %s1311_s15, %s1696_s0 }
  0x55   : > { %p1039_p11 = scmp.ne.s32.totalorder %s1311_s15, %s1038_s24  ;;  %p1045_p1 = scmp.lt.u32.totalorder %s1043_s11, %s1038_s24 }
  0x56   : > { %p1047_p4 = scmp.lt.u32.totalorder %s1038_s24, %s1311_s15 }
  0x57   : > { %p1041_p12 = pnand %p1040_p8, %p1039_p11  ;;  %p1046_p3 = por %p1045_p1, %p1044_p0 }
  0x59   : > { %p1042_p13 = pneg %p1041_p12  ;;  %p1048_p2 = por %p1047_p4, %p1046_p3 }
  0x5b   : > { %p1049_p5 = pnand %p1048_p2, %p1042_p13 }
  0x5d   : > { %1052 = shalt.err (!%p1049_p5)
}
  0x5e   : > { %s1053_s8 = scalar_lea.vmem %s1313_s17, 128  ;;  %s1152_s13 = smov [#allocation2]  }
  0x5f   : > { %p1054_p11 = scmp.ne.s32.totalorder %s1313_s17, %s1053_s8  ;;  %s1058_s14 = sshll.u32 %s1152_s13, 4  ;;  %s1059_s14 = int_to_ptr.vmem [resolvable:$false] %s1058_s14 }
  0x60   : > { %s1060_s16 = scalar_lea.vmem %s1059_s14, 256  ;;  %p1061_p7 = scmp.lt.s32.totalorder %s1313_s17, %s1059_s14 }
  0x61   : > { %p1056_p12 = pnand %p1054_p11, %p1040_p8  ;;  %p1062_p0 = scmp.lt.s32.totalorder %s1060_s16, %s1053_s8 }
  0x63   : > { %p1057_p9 = pneg %p1056_p12  ;;  %p1063_p1 = por %p1062_p0, %p1061_p7 }
  0x65   : > { %p1064_p3 = pnand %p1063_p1, %p1057_p9 }
  0x67   : > { %1067 = shalt.err (!%p1064_p3)
}
  0x68   : > { %927 = dma.hbm_to_vmem [thread:$0]  (!%p1317_p10), %s1311_s15, 128, %s1313_s17, %s223_s23  }
  0x69   : > { %p1698_p13 = scmp.ne.s32.totalorder %s1689_s26, 0 }
  0x6a   : > { %s1349_s24 = sand.u32 (!%p1698_p13), 1, %s1138_s19  }
  0x6b   : > { %243 = sbr.rel (%p1698_p13) target bundleno = 200 (0xc8), region = 40  ;;  %s810_s28 = sshll.u32 (!%p1698_p13), %s1349_s24, 3 }
  0x6c   : > { %s246_s29 = scalar_lea.sflag (!%p1698_p13), [#allocation3], %s1349_s24  ;;  %s249_s11 = scalar_lea.vmem (!%p1698_p13), [#allocation2], %s810_s28 }
  0x72   : > { %1113 = dma.done.wait (%p1292_p6), %s246_s29, 128  }
  0x73   : > { %1115 = vsyncadd (%p1292_p6), %s246_s29, 4294967168  ;;  %p1699_p7 = scmp.eq.s32.totalorder %s1208_s25, 0 }
  0x75   : > { %1117 = dma.done.wait (%p1699_p7), [#allocation5], 64   ;;  %p1700_p9 = pmov %p1699_p7 }
  0x76   : > { %p1701_p10 = pmov %p1699_p7 }
  0x77   : > { %1119 = vsyncadd (%p1700_p9), [#allocation5], 4294967232 }
  0x78   : > { %1121 = dma.done.wait (%p1701_p10), [#allocation8], 144   ;;  %p1702_p8 = pmov %p1699_p7 }
  0x79   : > { %p1703_p4 = pmov %p1699_p7 }
  0x7a   : > { %1123 = vsyncadd (%p1702_p8), [#allocation8], 4294967152 }
  0x7b   : > { %1125 = dma.done.wait (%p1703_p4), [#allocation11], 16   ;;  %p1704_p2 = pmov %p1703_p4 }
  0x7d   : > { %1127 = vsyncadd (%p1704_p2), [#allocation11], 4294967280 }
  0x7e   : > { %270 = sfence }
  0x7f   : > { %s294_s26 = sld [smem:[#allocation6]]  ;;  %v563_v0 = vlaneseq  ;;  %s816_s7 = sld [smem:[#allocation6 + $0x1]]  ;;  %v1371_v2 = vld [vmem:[%s249_s11] sm:$0xff]  ;;  %vm650_vm0 = vcmask 1040384   ;;  %vm653_vm1 = vcmask 1041408   ;;  %vm656_vm2 = vcmask 1042432  }
  0x80   : > { %s818_s15 = sld [smem:[#allocation6 + $0x2]]  ;;  %s820_s17 = sld [smem:[#allocation6 + $0x3]]  ;;  %vm659_vm3 = vcmask 1043456   ;;  %vm662_vm4 = vcmask 1044480   ;;  %vm665_vm5 = vcmask 1045504   ;;  %vm668_vm6 = vcmask 1046528  }
  0x81   : > { %s1369_s22 = sld [smem:[#allocation7]]  ;;  %v564_v1 = vshrl.u32 %v563_v0, 7  ;;  %s823_s6 = sld [smem:[#allocation6 + $0x81]] }
  0x82   : > { %s822_s23 = sld [smem:[#allocation6 + $0x80]]  ;;  %s825_s12 = sld [smem:[#allocation6 + $0x82]] }
  0x83   : > { %s1373_s8 = sld [smem:[#allocation6 + $0x83]]  ;;  %s1375_s13 = sld [smem:[#allocation6 + $0x100]]  ;;  %v1383_v5 = vsub.s32 0, %v564_v1  ;;  %v1393_v13 = vsub.s32 4, %v564_v1 }
  0x84   : > { %s1377_s14 = sld [smem:[#allocation6 + $0x101]]  ;;  %s1379_s16 = sld [smem:[#allocation6 + $0x102]] }
  0x85   : > { %v295_v3 = vstv %s294_s26  ;;  %v298_v4 = vstv %s816_s7  ;;  %s1381_s28 = sld [smem:[#allocation6 + $0x103]]  ;;  %s1387_s29 = sld [smem:[#allocation7 + $0x1]] }
  0x86   : > { %v296_v6 = vmul.f32 %v295_v3, %v1371_v2  ;;  %v299_v7 = vmul.f32 %v298_v4, %v1371_v2  ;;  %v306_v8 = vstv %s818_s15  ;;  %v314_v9 = vstv %s820_s17  ;;  %s1389_s11 = sld [smem:[#allocation6 + $0x180]]  ;;  %s1396_s26 = sld [smem:[#allocation6 + $0x181]] }
  0x87   : > { %v307_v10 = vmul.f32 %v306_v8, %v1371_v2  ;;  %v315_v11 = vmul.f32 %v314_v9, %v1371_v2  ;;  %v322_v15 = vstv %s1369_s22  ;;  %v329_v16 = vstv %s823_s6  ;;  %s1398_s7 = sld [smem:[#allocation6 + $0x182]]  ;;  %s1407_s17 = sld [smem:[#allocation6 + $0x183]] }
  0x88   : > { %v326_v12 = vstv %s822_s23  ;;  %v817_v14 = vrot.slane %v299_v7, 9  ;;  %v337_v17 = vstv %s825_s12  ;;  %v330_v20 = vmul.f32 %v329_v16, %v1371_v2  ;;  %s1403_s15 = sld [smem:[#allocation7 + $0x2]]  ;;  %s1409_s22 = sld [smem:[#allocation9]] }
  0x89   : > { %v819_v18 = vrot.slane %v307_v10, 10  ;;  %v327_v19 = vmul.f32 %v326_v12, %v1371_v2  ;;  %v338_v21 = vmul.f32 %v337_v17, %v1371_v2  ;;  %v821_v23 = vrot.slane %v315_v11, 11  ;;  %s1416_s23 = sld [smem:[#allocation7 + $0x3]]  ;;  %s1418_s6 = sld [smem:[#allocation9 + $0x1]] }
  0x8a   : > { %v304_v22 = vadd.f32 %v817_v14, %v296_v6  ;;  %v345_v24 = vstv %s1373_s8  ;;  %v357_v25 = vstv %s1375_s13  ;;  %v824_v26 = vrot.slane %v330_v20, 9  ;;  %s1422_s12 = sld [smem:[#allocation9 + $0x2]]  ;;  %s1424_s8 = sld [smem:[#allocation9 + $0x3]] }
  0x8b   : > { %v826_v27 = vrot.slane %v338_v21, 10  ;;  %v346_v28 = vmul.f32 %v345_v24, %v1371_v2  ;;  %v358_v29 = vmul.f32 %v357_v25, %v1371_v2  ;;  %v360_v31 = vstv %s1377_s14  ;;  %s1429_s13 = sld [smem:[#allocation9 + $0x80]]  ;;  %s1431_s14 = sld [smem:[#allocation9 + $0x81]] }
  0x8c   : > { %v312_v30 = vadd.f32 %v819_v18, %v304_v22  ;;  %v368_v32 = vstv %s1379_s16  ;;  %v376_v33 = vstv %s1381_s28  ;;  %v335_v34 = vadd.f32 %v824_v26, %v327_v19  ;;  %s1434_s16 = sld [smem:[#allocation10]]  ;;  %s1438_s28 = sld [smem:[#allocation9 + $0x82]] }
  0x8d   : > { %v828_v35 = vrot.slane %v346_v28, 11  ;;  %v361_v36 = vmul.f32 %v360_v31, %v1371_v2  ;;  %v369_v37 = vmul.f32 %v368_v32, %v1371_v2  ;;  %v353_v39 = vstv %s1387_s29  ;;  %s1440_s29 = sld [smem:[#allocation9 + $0x83]]  ;;  %s1455_s0 = sld [smem:[#allocation10 + $0x1]] }
  0x8e   : > { %v320_v38 = vadd.f32 %v821_v23, %v312_v30  ;;  %v377_v40 = vmul.f32 %v376_v33, %v1371_v2  ;;  %v388_v41 = vstv %s1389_s11  ;;  %v343_v42 = vadd.f32 %v826_v27, %v335_v34  ;;  %s1444_s11 = sld [smem:[#allocation9 + $0x100]]  ;;  %p1705_p5 = scmp.ne.s32.totalorder %s1694_s9, 0 }
  0x8f   : > { %v832_v43 = vrot.slane %v361_v36, 9  ;;  %v834_v44 = vrot.slane %v369_v37, 10  ;;  %v389_v45 = vmul.f32 %v388_v41, %v1371_v2  ;;  %v391_v48 = vstv %s1396_s26  ;;  %s1451_s26 = sld [smem:[#allocation9 + $0x101]] }
  0x90   : > { %v323_v46 = vadd.f32 %v322_v15, %v320_v38  ;;  %v836_v47 = vrot.slane %v377_v40, 11  ;;  %v399_v49 = vstv %s1398_s7  ;;  %v351_v50 = vadd.f32 %v828_v35, %v343_v42  ;;  %s1453_s7 = sld [smem:[#allocation9 + $0x102]] }
  0x91   : > { %v366_v51 = vadd.f32 %v832_v43, %v358_v29  ;;  %v392_v52 = vmul.f32 %v391_v48, %v1371_v2  ;;  %v400_v53 = vmul.f32 %v399_v49, %v1371_v2  ;;  %v384_v55 = vstv %s1403_s15  ;;  %s1461_s15 = sld [smem:[#allocation9 + $0x103]] }
  0x92   : > { %v1446_v54 = vmax.f32 %v323_v46, 0.0  ;;  %v407_v56 = vstv %s1407_s17  ;;  %v419_v57 = vstv %s1409_s22  ;;  %v354_v58 = vadd.f32 %v353_v39, %v351_v50  ;;  %s1463_s17 = sld [smem:[#allocation9 + $0x180]]  ;;  %s1468_s22 = sld [smem:[#allocation9 + $0x181]] }
  0x93   : > { %v374_v59 = vadd.f32 %v834_v44, %v366_v51  ;;  %v840_v60 = vrot.slane %v392_v52, 9  ;;  %v842_v61 = vrot.slane %v400_v53, 10  ;;  %v408_v62 = vmul.f32 %v407_v56, %v1371_v2 }
  0x94   : > { %v415_v63 = vstv %s1416_s23  ;;  %v420_v0 = vmul.f32 %v419_v57, %v1446_v54  ;;  %v422_v1 = vstv %s1418_s6  ;;  %v1465_v3 = vmax.f32 %v354_v58, 0.0  ;;  %s1473_s23 = sld [smem:[#allocation9 + $0x182]]  ;;  %s1475_s6 = sld [smem:[#allocation9 + $0x183]] }
  0x95   : > { %v382_v4 = vadd.f32 %v836_v47, %v374_v59  ;;  %v397_v6 = vadd.f32 %v840_v60, %v389_v45  ;;  %v426_v7 = vstv %s1422_s12  ;;  %v844_v8 = vrot.slane %v408_v62, 11  ;;  %s1483_s12 = sld [smem:[#allocation10 + $0x2]] }
  0x96   : > { %v430_v2 = vstv %s1424_s8  ;;  %v437_v9 = vstv %s1429_s13  ;;  %v440_v10 = vstv %s1431_s14  ;;  %v423_v14 = vmul.f32 %v422_v1, %v1465_v3  ;;  %s1488_s8 = sld [smem:[#allocation9 + $0x200]]  ;;  %s1493_s13 = sld [smem:[#allocation9 + $0x201]] }
  0x97   : > { %v385_v11 = vadd.f32 %v384_v55, %v382_v4  ;;  %v405_v12 = vadd.f32 %v842_v61, %v397_v6  ;;  %v438_v15 = vmul.f32 %v437_v9, %v1446_v54  ;;  %v434_v16 = vstv %s1434_s16  ;;  %s1495_s14 = sld [smem:[#allocation9 + $0x202]]  ;;  %s1500_s16 = sld [smem:[#allocation10 + $0x3]] }
  0x98   : > { %v441_v17 = vmul.f32 %v440_v10, %v1465_v3  ;;  %v444_v18 = vstv %s1438_s28  ;;  %v448_v19 = vstv %s1440_s29  ;;  %v424_v22 = vadd.f32 %v423_v14, %v420_v0  ;;  %s1506_s28 = sld [smem:[#allocation9 + $0x203]]  ;;  %s1510_s29 = sld [smem:[#allocation9 + $0x280]] }
  0x99   : > { %v1485_v20 = vmax.f32 %v385_v11, 0.0  ;;  %v413_v21 = vadd.f32 %v844_v8, %v405_v12  ;;  %v455_v23 = vstv %s1444_s11  ;;  %v458_v26 = vstv %s1451_s26  ;;  %s1512_s11 = sld [smem:[#allocation9 + $0x281]]  ;;  %s1520_s26 = sld [smem:[#allocation9 + $0x282]] }
  0x9a   : > { %v442_v24 = vadd.f32 %v441_v17, %v438_v15  ;;  %v456_v25 = vmul.f32 %v455_v23, %v1446_v54  ;;  %v462_v27 = vstv %s1453_s7  ;;  %v459_v31 = vmul.f32 %v458_v26, %v1465_v3  ;;  %s1525_s7 = sld [smem:[#allocation9 + $0x283]] }
  0x9b   : > { %v416_v28 = vadd.f32 %v415_v63, %v413_v21  ;;  %v427_v29 = vmul.f32 %v426_v7, %v1485_v20  ;;  %v445_v30 = vmul.f32 %v444_v18, %v1485_v20  ;;  %v452_v32 = vstv %s1455_s0  ;;  %s1518_s0 = sld [smem:[#allocation10 + $0x4]] }
  0x9c   : > { %v463_v33 = vmul.f32 %v462_v27, %v1485_v20  ;;  %v466_v34 = vstv %s1461_s15  ;;  %v473_v35 = vstv %s1463_s17  ;;  %v460_v39 = vadd.f32 %v459_v31, %v456_v25  ;;  %s1531_s15 = sld [smem:[#allocation10 + $0x5]]  ;;  %s1533_s17 = sld [smem:[#allocation9 + $0x300]] }
  0x9d   : > { %v1508_v36 = vmax.f32 %v416_v28, 0.0  ;;  %v428_v37 = vadd.f32 %v427_v29, %v424_v22  ;;  %v446_v38 = vadd.f32 %v445_v30, %v442_v24  ;;  %v474_v40 = vmul.f32 %v473_v35, %v1446_v54 }
  0x9e   : > { %v476_v41 = vstv %s1468_s22  ;;  %v480_v42 = vstv %s1473_s23  ;;  %v484_v43 = vstv %s1475_s6  ;;  %v464_v46 = vadd.f32 %v463_v33, %v460_v39  ;;  %s1536_s22 = sld [smem:[#allocation9 + $0x301]]  ;;  %s1538_s23 = sld [smem:[#allocation9 + $0x302]] }
  0x9f   : > { %v431_v44 = vmul.f32 %v430_v2, %v1508_v36  ;;  %v449_v45 = vmul.f32 %v448_v19, %v1508_v36  ;;  %v467_v47 = vmul.f32 %v466_v34, %v1508_v36  ;;  %v470_v48 = vstv %s1483_s12  ;;  %s1543_s6 = sld [smem:[#allocation9 + $0x303]]  ;;  %s1551_s12 = sld [smem:[#allocation9 + $0x380]] }
  0xa0   : > { %v477_v49 = vmul.f32 %v476_v41, %v1465_v3  ;;  %v481_v50 = vmul.f32 %v480_v42, %v1485_v20  ;;  %v485_v51 = vmul.f32 %v484_v43, %v1508_v36  ;;  %v491_v56 = vstv %s1488_s8  ;;  %s1557_s8 = sld [smem:[#allocation10 + $0x6]] }
  0xa1   : > { %v432_v52 = vadd.f32 %v431_v44, %v428_v37  ;;  %v450_v53 = vadd.f32 %v449_v45, %v446_v38  ;;  %v468_v55 = vadd.f32 %v467_v47, %v464_v46  ;;  %v492_v58 = vmul.f32 %v491_v56, %v1446_v54 }
  0xa2   : > { %v478_v57 = vadd.f32 %v477_v49, %v474_v40  ;;  %v494_v59 = vstv %s1493_s13  ;;  %v498_v60 = vstv %s1495_s14  ;;  %v488_v63 = vstv %s1500_s16  ;;  %s1559_s13 = sld [smem:[#allocation9 + $0x381]]  ;;  %s1564_s14 = sld [smem:[#allocation9 + $0x382]] }
  0xa3   : > { %v1545_v61 = vadd.f32 %v434_v16, %v432_v52  ;;  %v1547_v62 = vadd.f32 %v452_v32, %v450_v53  ;;  %v495_v0 = vmul.f32 %v494_v59, %v1465_v3  ;;  %v1553_v1 = vadd.f32 %v470_v48, %v468_v55  ;;  %s1566_s16 = sld [smem:[#allocation9 + $0x383]] }
  0xa4   : > { %v482_v4 = vadd.f32 %v481_v50, %v478_v57  ;;  %v499_v6 = vmul.f32 %v498_v60, %v1485_v20  ;;  %v502_v7 = vstv %s1506_s28  ;;  %v509_v9 = vstv %s1510_s29  ;;  %s1580_s28 = sld [smem:[#allocation10 + $0x7]]  ;;  %s815_s29 = sshll.u32 %s1349_s24, 4 }
  0xa5   : > { %v496_v8 = vadd.f32 %v495_v0, %v492_v58  ;;  %v503_v2 = vmul.f32 %v502_v7, %v1508_v36  ;;  %v512_v10 = vstv %s1512_s11  ;;  %v506_v11 = vstv %s1518_s0  ;;  %s890_s11 = sshll.u32 %s1208_s25, 8  ;;  %s292_s0 = scalar_lea.vmem [#allocation12], %s815_s29 }
  0xa6   : > { %v510_v12 = vmul.f32 %v509_v9, %v1446_v54  ;;  %v513_v14 = vmul.f32 %v512_v10, %v1465_v3  ;;  %v516_v15 = vstv %s1520_s26  ;;  %v486_v16 = vadd.f32 %v485_v51, %v482_v4  ;;  %s688_s26 = sshll.u32 %s292_s0, 4  ;;  %s1637_s26 = int_to_ptr.vmem [resolvable:$true] %s688_s26 }
  0xa7   : > { %v500_v17 = vadd.f32 %v499_v6, %v496_v8  ;;  %v517_v18 = vmul.f32 %v516_v15, %v1485_v20  ;;  %v520_v19 = vstv %s1525_s7  ;;  %v524_v23 = vstv %s1531_s15  ;;  %s1635_s15 = scalar_lea.hbm %s1684_s5, %s890_s11 }
  0xa8   : > { %v514_v21 = vadd.f32 %v513_v14, %v510_v12  ;;  %v521_v22 = vmul.f32 %v520_v19, %v1508_v36  ;;  %v527_v24 = vstv %s1533_s17  ;;  %v530_v27 = vstv %s1536_s22  ;;  %s674_s17 = scalar_lea.sflag [#allocation4], %s1349_s24  ;;  %s1068_s22 = scalar_lea.vmem %s1637_s26, 256 }
  0xa9   : > { %v504_v25 = vadd.f32 %v503_v2, %v500_v17  ;;  %v528_v26 = vmul.f32 %v527_v24, %v1446_v54  ;;  %v534_v28 = vstv %s1538_s23  ;;  %v531_v30 = vmul.f32 %v530_v27, %v1465_v3  ;;  %p1069_p6 = scmp.ne.s32.totalorder %s1637_s26, %s1068_s22  ;;  %s1153_s23 = smov [#allocation12]  }
  0xaa   : > { %v518_v29 = vadd.f32 %v517_v18, %v514_v21  ;;  %v535_v31 = vmul.f32 %v534_v28, %v1485_v20  ;;  %v538_v32 = vstv %s1543_s6  ;;  %v489_v33 = vadd.f32 %v488_v63, %v486_v16  ;;  %s1072_s6 = sshll.u32 %s1153_s23, 4  ;;  %s1073_s6 = int_to_ptr.vmem [resolvable:$false] %s1072_s6 }
  0xab   : > { %v507_v34 = vadd.f32 %v506_v11, %v504_v25  ;;  %v539_v35 = vmul.f32 %v538_v32, %v1508_v36  ;;  %v545_v37 = vstv %s1551_s12  ;;  %v532_v39 = vadd.f32 %v531_v30, %v528_v26  ;;  %p1070_p11 = pnand %p1069_p6, %p1705_p5  ;;  %s1074_s12 = scalar_lea.vmem %s1073_s6, 512 }
  0xac   : > { %v522_v38 = vadd.f32 %v521_v22, %v518_v29  ;;  %v546_v40 = vmul.f32 %v545_v37, %v1446_v54  ;;  %v548_v41 = vstv %s1559_s13  ;;  %v542_v42 = vstv %s1557_s8  ;;  %p1075_p0 = scmp.lt.s32.totalorder %s1637_s26, %s1073_s6  ;;  %p1076_p1 = scmp.lt.s32.totalorder %s1074_s12, %s1068_s22 }
  0xad   : > { %v549_v43 = vmul.f32 %v548_v41, %v1465_v3  ;;  %v552_v44 = vstv %s1564_s14  ;;  %v556_v45 = vstv %s1566_s16  ;;  %v536_v47 = vadd.f32 %v535_v31, %v532_v39  ;;  %p1071_p12 = pneg %p1070_p11 }
  0xae   : > { %v525_v46 = vadd.f32 %v524_v23, %v522_v38  ;;  %v553_v48 = vmul.f32 %v552_v44, %v1485_v20  ;;  %v557_v49 = vmul.f32 %v556_v45, %v1508_v36  ;;  %v566_v51 = vrot.slane %v1545_v61, %v1383_v5  ;;  %p1077_p3 = por %p1076_p1, %p1075_p0 }
  0xaf   : > { %v550_v50 = vadd.f32 %v549_v43, %v546_v40  ;;  %v570_v54 = vrot.slane %v1545_v61, %v1393_v13  ;;  %v577_v3 = vrot.slane %v1547_v62, %v1383_v5  ;;  %v540_v52 = vadd.f32 %v539_v35, %v536_v47 }
  0xb0   : > { %v581_v53 = vrot.slane %v1547_v62, %v1393_v13  ;;  %v588_v20 = vrot.slane %v1553_v1, %v1383_v5  ;;  %v592_v36 = vrot.slane %v1553_v1, %v1393_v13  ;;  %v560_v56 = vstv %s1580_s28  ;;  %p1078_p13 = pnand %p1077_p3, %p1071_p12 }
  0xb1   : > { %v554_v55 = vadd.f32 %v553_v48, %v550_v50  ;;  %v599_v57 = vrot.slane %v489_v33, %v1383_v5  ;;  %v603_v58 = vrot.slane %v489_v33, %v1393_v13  ;;  %v543_v59 = vadd.f32 %v542_v42, %v540_v52 }
  0xb2   : > { %v610_v60 = vrot.slane %v507_v34, %v1383_v5  ;;  %v614_v61 = vrot.slane %v507_v34, %v1393_v13  ;;  %v621_v62 = vrot.slane %v525_v46, %v1383_v5  ;;  %v625_v0 = vrot.slane %v525_v46, %v1393_v13 }
  0xb3   : > { %v558_v63 = vadd.f32 %v557_v49, %v554_v55  ;;  %v651_v1 = vsel %vm650_vm0, %v566_v51, %v577_v3  ;;  %v652_v4 = vsel %vm650_vm0, %v570_v54, %v581_v53  ;;  %v632_v6 = vrot.slane %v543_v59, %v1383_v5 }
  0xb4   : > { %v636_v7 = vrot.slane %v543_v59, %v1393_v13  ;;  %v654_v8 = vsel %vm653_vm1, %v651_v1, %v588_v20  ;;  %v655_v2 = vsel %vm653_vm1, %v652_v4, %v592_v36 }
  0xb5   : > { %v561_v9 = vadd.f32 %v560_v56, %v558_v63  ;;  %v657_v10 = vsel %vm656_vm2, %v654_v8, %v599_v57  ;;  %v658_v11 = vsel %vm656_vm2, %v655_v2, %v603_v58 }
  0xb6   : > { %v660_v12 = vsel %vm659_vm3, %v657_v10, %v610_v60  ;;  %v661_v14 = vsel %vm659_vm3, %v658_v11, %v614_v61 }
  0xb7   : > { %v643_v15 = vrot.slane %v561_v9, %v1383_v5  ;;  %v647_v16 = vrot.slane %v561_v9, %v1393_v13  ;;  %v663_v17 = vsel %vm662_vm4, %v660_v12, %v621_v62  ;;  %v664_v18 = vsel %vm662_vm4, %v661_v14, %v625_v0 }
  0xb8   : > { %v666_v19 = vsel %vm665_vm5, %v663_v17, %v632_v6  ;;  %v667_v21 = vsel %vm665_vm5, %v664_v18, %v636_v7 }
  0xb9   : > { %v669_v22 = vsel %vm668_vm6, %v666_v19, %v643_v15  ;;  %v670_v5 = vsel %vm668_vm6, %v667_v21, %v647_v16 }
  0xba   : > { %671 = vst [vmem:[%s292_s0] sm:$0xff] %v669_v22  ;;  %672 = vst [vmem:[%s292_s0 + $0x8] sm:$0xff] %v670_v5 }
  0xbb   : > { %1081 = shalt.err (!%p1078_p13)
}
  0xbc   : > { %s1082_s24 = scalar_lea.hbm %s1635_s15, 256  ;;  %s1086_s14 = scalar_lea.hbm %s1684_s5, 512 }
  0xbd   : > { %p1083_p7 = scmp.ne.s32.totalorder %s1635_s15, %s1082_s24  ;;  %p1087_p8 = scmp.lt.u32.totalorder %s1635_s15, %s1684_s5 }
  0xbe   : > { %p1088_p4 = scmp.lt.u32.totalorder %s1086_s14, %s1082_s24  ;;  %p1090_p6 = scmp.lt.u32.totalorder %s1082_s24, %s1635_s15 }
  0xbf   : > { %p1084_p9 = pnand %p1083_p7, %p1705_p5 }
  0xc0   : > { %p1089_p2 = por %p1088_p4, %p1087_p8 }
  0xc1   : > { %p1085_p10 = pneg %p1084_p9 }
  0xc2   : > { %p1091_p11 = por %p1090_p6, %p1089_p2 }
  0xc4   : > { %p1092_p12 = pnand %p1091_p11, %p1085_p10 }
  0xc6   : > { %1095 = shalt.err (!%p1092_p12)
}
  0xc7   : > { %909 = dma.vmem_to_hbm [thread:$0]  (%p1705_p5), %s1637_s26, 256, %s1635_s15, %s674_s17  }
  0xc8 PF: > { %s700_s29 = sand.u32 1, %s1134_s18   ;;  %p1706_p0 = scmp.ne.s32.totalorder %s1695_s10, 0 }
  0xc9   : > { %p1707_p1 = scmp.ge.s32.totalorder %s1146_s21, 2  ;;  %s701_s11 = scalar_lea.sflag [#allocation4], %s700_s29 }
  0xcb   : > { %p929_p3 = pnand %p1707_p1, %p1706_p0 }
  0xcd   : > { %1129 = dma.done.wait (!%p929_p3), %s701_s11, 256  }
  0xce   : > { %1131 = vsyncadd (!%p929_p3), %s701_s11, 4294967040  ;;  %p21_p13 = scmp.ge.s32.totalorder %s1273_s27, 4   ;;  %s1708_s18 = smov %s1138_s19 }
  0xcf   : > { %s1709_s19 = smov %s1142_s20  ;;  %s1710_s20 = smov %s1284_s30 }
  0xd0   : > { %s1711_s21 = smov %s1273_s27  ;;  %23 = sbr.rel (!%p21_p13) target bundleno = 10 (0xa), region = 102 }
  0xd7   :  { %706 = vsyncpa [#allocation3], 1 }
  0xd8   :  { %708 = vsyncpa [#allocation3 + $0x1], 1 }
  0xd9   :  { %709 = vsyncpa [#allocation4], 1 }
  0xda   :  { %711 = vsyncpa [#allocation4 + $0x1], 1 }
  0xdb   :  { %712 = vsyncpa [#allocation5], 1 }
  0xdc   :  { %714 = vsyncpa [#allocation5 + $0x1], 1 }
  0xdd   :  { %715 = vsyncpa [#allocation8], 1 }
  0xde   :  { %716 = vsyncpa [#allocation11], 1 }

</bundles_post_ra>
